<compile_context>
chip_gen: v7x
topology: tpu7x:2x2x1
jax: 0.10.0
libtpu: 0.0.40
codegen_flags: <defaults>
</compile_context>

<pallas_src>
import jax
import jax.numpy as jnp
from jax.experimental import pallas as pl
from jax.experimental.pallas import tpu as pltpu


def _sigmoid(z):
    # sigmoid(z) == 0.5 * tanh(0.5 * z) + 0.5  -- single EUP op (tanh) instead
    # of exp + divide; keeps the divide off the VPU as well.
    return 0.5 * jnp.tanh(0.5 * z) + 0.5


def _mlp_kernel(x_ref, w1_ref, b1_ref, w2_ref, b2_ref, w3_ref, b3_ref, o_ref):
    # x_ref: (n_in, tile_b) -- batch lives on the lane axis.
    # Weights are PyTorch-layout (out, in); biases are (out, 1) columns.
    x = x_ref[...]

    h1 = jnp.dot(w1_ref[...], x, preferred_element_type=jnp.float32) + b1_ref[...]
    h1 = _sigmoid(h1)                                     # (30, tile_b)

    h2 = jnp.dot(w2_ref[...], h1, preferred_element_type=jnp.float32) + b2_ref[...]
    h2 = _sigmoid(h2)                                     # (30, tile_b)

    h3 = jnp.dot(w3_ref[...], h2, preferred_element_type=jnp.float32) + b3_ref[...]
    o_ref[...] = _sigmoid(h3).astype(o_ref.dtype)         # (1, tile_b) lane-dense store


def _round_up(n, m):
    return (n + m - 1) // m * m


def _pick_tile(batch, max_tile_b):
    """Choose a lane-axis batch tile (multiple of 128)."""
    padded128 = _round_up(batch, 128)
    if padded128 <= max_tile_b:
        # Single tile with minimal (<128 rows) padding.
        tile_b = padded128
    else:
        tile_b = max_tile_b
        # Shrink (halving, >=1024) to cap batch-padding waste at ~12.5%.
        while tile_b > 1024 and (_round_up(batch, tile_b) - batch) * 8 > batch:
            tile_b //= 2

    padded_batch = _round_up(batch, tile_b)
    # v7x megacore: when there is enough work, make sure there are >= 2 tiles
    # so both TensorCores participate (harmless on single-TC v5e/v6e).
    if padded_batch // tile_b < 2 and padded_batch >= 2048:
        tile_b = _round_up(padded_batch // 2, 128)
        padded_batch = _round_up(batch, tile_b)
    return tile_b, padded_batch


def neural_network_forward(x, params, *, max_tile_b=16384):
    """Forward pass matching NeuralNetwork.forward.

    x: (batch, n_input_features) float32
    params: dict with PyTorch-layout weights/biases:
        w1 (30, n_in), b1 (30,), w2 (30, 30), b2 (30,), w3 (1, 30), b3 (1,)
    returns: (batch, 1) float32
    """
    batch, n_in = x.shape
    w1, w2, w3 = params["w1"], params["w2"], params["w3"]
    b1 = params["b1"].reshape(-1, 1)   # (30, 1) -- broadcasts over lanes
    b2 = params["b2"].reshape(-1, 1)   # (30, 1)
    b3 = params["b3"].reshape(-1, 1)   # (1, 1)
    h1_dim = w1.shape[0]               # 30
    h2_dim = w2.shape[0]               # 30
    out_dim = w3.shape[0]              # 1

    tile_b, padded_batch = _pick_tile(batch, max_tile_b)
    num_tiles = padded_batch // tile_b

    # Batch on the lane axis: (n_in, padded_batch).
    xt = x.T
    if padded_batch != batch:
        xt = jnp.pad(xt, ((0, 0), (0, padded_batch - batch)))

    const_map = lambda i: (0, 0)       # weights/biases: one block, VMEM-resident

    flops = 2 * batch * (n_in * h1_dim + h1_dim * h2_dim + h2_dim * out_dim)
    transcendentals = batch * (h1_dim + h2_dim + out_dim)
    weight_bytes = (w1.size + w2.size + w3.size + b1.size + b2.size + b3.size) * 4
    bytes_accessed = batch * (n_in + out_dim) * 4 + weight_bytes

    out = pl.pallas_call(
        _mlp_kernel,
        out_shape=jax.ShapeDtypeStruct((out_dim, padded_batch), jnp.float32),
        grid=(num_tiles,),
        in_specs=[
            pl.BlockSpec((n_in, tile_b), lambda i: (0, i)),   # x^T: tiled on lanes
            pl.BlockSpec((h1_dim, n_in), const_map),          # w1 (30, n_in)
            pl.BlockSpec((h1_dim, 1), const_map),             # b1 (30, 1)
            pl.BlockSpec((h2_dim, h1_dim), const_map),        # w2 (30, 30)
            pl.BlockSpec((h2_dim, 1), const_map),             # b2 (30, 1)
            pl.BlockSpec((out_dim, h2_dim), const_map),       # w3 (1, 30)
            pl.BlockSpec((out_dim, 1), const_map),            # b3 (1, 1)
        ],
        out_specs=pl.BlockSpec((out_dim, tile_b), lambda i: (0, i)),
        compiler_params=pltpu.CompilerParams(
            dimension_semantics=("parallel",),                # megacore split on v7x
            vmem_limit_bytes=32 * 1024 * 1024,
        ),
        cost_estimate=pl.CostEstimate(
            flops=flops,
            transcendentals=transcendentals,
            bytes_accessed=bytes_accessed,
        ),
    )(xt, w1, b1, w2, b2, w3, b3)

    # (1, padded_batch) -> (batch, 1)
    return out[0, :batch].reshape(batch, 1)


def init_params(key, n_input_features=10):
    """Deterministic init mimicking nn.Linear's U(-1/sqrt(fan_in), 1/sqrt(fan_in)).

    Weights are kept in native PyTorch layout (out_features, in_features),
    biases as (out_features,), so a real state_dict drops in unchanged.
    """
    ks = jax.random.split(key, 6)

    def linear(kw, kb, fan_in, fan_out):
        bound = 1.0 / jnp.sqrt(jnp.float32(fan_in))
        w = jax.random.uniform(kw, (fan_out, fan_in), jnp.float32, -bound, bound)
        b = jax.random.uniform(kb, (fan_out,), jnp.float32, -bound, bound)
        return w, b

    w1, b1 = linear(ks[0], ks[1], n_input_features, 30)
    w2, b2 = linear(ks[2], ks[3], 30, 30)
    w3, b3 = linear(ks[4], ks[5], 30, 1)
    return {"w1": w1, "b1": b1, "w2": w2, "b2": b2, "w3": w3, "b3": b3}


def _reference_forward(x, p):
    h1 = jax.nn.sigmoid(x @ p["w1"].T + p["b1"])
    h2 = jax.nn.sigmoid(h1 @ p["w2"].T + p["b2"])
    return jax.nn.sigmoid(h2 @ p["w3"].T + p["b3"])


if __name__ == "__main__":
    key = jax.random.PRNGKey(0)
    k_x, k_x2, k_x3, k_p = jax.random.split(key, 4)

    n_input_features = 10
    params = init_params(k_p, n_input_features)

    # Small canonical case (single tile).
    batch = 8
    x = jax.random.normal(k_x, (batch, n_input_features), dtype=jnp.float32)
    y_pred = jax.block_until_ready(neural_network_forward(x, params))
    y_ref = _reference_forward(x, params)
    assert y_pred.shape == (batch, 1)
    assert jnp.allclose(y_pred, y_ref, atol=1e-5, rtol=1e-5)

    # Ragged batch (exercises lane padding + output slicing).
    batch2 = 37
    x2 = jax.random.normal(k_x2, (batch2, n_input_features), dtype=jnp.float32)
    y_pred2 = jax.block_until_ready(neural_network_forward(x2, params))
    y_ref2 = _reference_forward(x2, params)
    assert y_pred2.shape == (batch2, 1)
    assert jnp.allclose(y_pred2, y_ref2, atol=1e-5, rtol=1e-5)

    # Multi-tile path (small tile cap forces a >1 grid and a padded last tile).
    batch3 = 300
    x3 = jax.random.normal(k_x3, (batch3, n_input_features), dtype=jnp.float32)
    y_pred3 = jax.block_until_ready(
        neural_network_forward(x3, params, max_tile_b=128))
    y_ref3 = _reference_forward(x3, params)
    assert y_pred3.shape == (batch3, 1)
    assert jnp.allclose(y_pred3, y_ref3, atol=1e-5, rtol=1e-5)

    print("KERNEL_OK")
</pallas_src>

<mosaic_0001>
module attributes {stable_mosaic.version = 11 : i64} {
  func.func @_mlp_kernel(%arg0: i32, %arg1: memref<10x128xf32, #tpu.memory_space<vmem>>, %arg2: memref<30x10xf32, #tpu.memory_space<vmem>>, %arg3: memref<30x1xf32, #tpu.memory_space<vmem>>, %arg4: memref<30x30xf32, #tpu.memory_space<vmem>>, %arg5: memref<30x1xf32, #tpu.memory_space<vmem>>, %arg6: memref<1x30xf32, #tpu.memory_space<vmem>>, %arg7: memref<1x1xf32, #tpu.memory_space<vmem>>, %arg8: memref<1x128xf32, #tpu.memory_space<vmem>>) attributes {dimension_semantics = [#tpu.dimension_semantics<parallel>], iteration_bounds = array<i64: 1>, scalar_prefetch = 0 : i64, scratch_operands = 0 : i64, tpu.core_type = #tpu.core_type<tc>, window_params = [{transform_indices = @transform_0, window_bounds = array<i64: 10, 128>}, {pipeline_mode = #tpu.pipeline_mode<synchronous>, transform_indices = @transform_1, window_bounds = array<i64: 30, 10>}, {pipeline_mode = #tpu.pipeline_mode<synchronous>, transform_indices = @transform_2, window_bounds = array<i64: 30, 1>}, {pipeline_mode = #tpu.pipeline_mode<synchronous>, transform_indices = @transform_3, window_bounds = array<i64: 30, 30>}, {pipeline_mode = #tpu.pipeline_mode<synchronous>, transform_indices = @transform_4, window_bounds = array<i64: 30, 1>}, {pipeline_mode = #tpu.pipeline_mode<synchronous>, transform_indices = @transform_5, window_bounds = array<i64: 1, 30>}, {pipeline_mode = #tpu.pipeline_mode<synchronous>, transform_indices = @transform_6, window_bounds = array<i64: 1, 1>}, {transform_indices = @transform_7, window_bounds = array<i64: 1, 128>}]} {
    %c0 = arith.constant 0 : index
    %c0_0 = arith.constant 0 : index
    %0 = vector.load %arg1[%c0, %c0_0] : memref<10x128xf32, #tpu.memory_space<vmem>>, vector<10x128xf32>
    %c0_1 = arith.constant 0 : index
    %c0_2 = arith.constant 0 : index
    %1 = vector.load %arg2[%c0_1, %c0_2] : memref<30x10xf32, #tpu.memory_space<vmem>>, vector<30x10xf32>
    %cst = arith.constant dense<0.000000e+00> : vector<30x128xf32>
    %2 = tpu.matmul %1, %0, %cst {dimension_numbers = #tpu.dot_dimension_numbers<[1], [0], [0], [1], [0, 0, 1, 1], [], []>} : vector<30x10xf32>, vector<10x128xf32>, vector<30x128xf32> -> vector<30x128xf32>
    %c0_3 = arith.constant 0 : index
    %c0_4 = arith.constant 0 : index
    %3 = vector.load %arg3[%c0_3, %c0_4] : memref<30x1xf32, #tpu.memory_space<vmem>>, vector<30x1xf32>
    %4 = vector.broadcast %3 : vector<30x1xf32> to vector<30x128xf32>
    %5 = arith.addf %2, %4 : vector<30x128xf32>
    %cst_5 = arith.constant 5.000000e-01 : f32
    %6 = vector.broadcast %cst_5 : f32 to vector<30x128xf32>
    %7 = arith.mulf %6, %5 : vector<30x128xf32>
    %8 = math.tanh %7 : vector<30x128xf32>
    %cst_6 = arith.constant 5.000000e-01 : f32
    %9 = vector.broadcast %cst_6 : f32 to vector<30x128xf32>
    %10 = arith.mulf %9, %8 : vector<30x128xf32>
    %cst_7 = arith.constant 5.000000e-01 : f32
    %11 = vector.broadcast %cst_7 : f32 to vector<30x128xf32>
    %12 = arith.addf %10, %11 : vector<30x128xf32>
    %c0_8 = arith.constant 0 : index
    %c0_9 = arith.constant 0 : index
    %13 = vector.load %arg4[%c0_8, %c0_9] : memref<30x30xf32, #tpu.memory_space<vmem>>, vector<30x30xf32>
    %cst_10 = arith.constant dense<0.000000e+00> : vector<30x128xf32>
    %14 = tpu.matmul %13, %12, %cst_10 {dimension_numbers = #tpu.dot_dimension_numbers<[1], [0], [0], [1], [0, 0, 1, 1], [], []>} : vector<30x30xf32>, vector<30x128xf32>, vector<30x128xf32> -> vector<30x128xf32>
    %c0_11 = arith.constant 0 : index
    %c0_12 = arith.constant 0 : index
    %15 = vector.load %arg5[%c0_11, %c0_12] : memref<30x1xf32, #tpu.memory_space<vmem>>, vector<30x1xf32>
    %16 = vector.broadcast %15 : vector<30x1xf32> to vector<30x128xf32>
    %17 = arith.addf %14, %16 : vector<30x128xf32>
    %cst_13 = arith.constant 5.000000e-01 : f32
    %18 = vector.broadcast %cst_13 : f32 to vector<30x128xf32>
    %19 = arith.mulf %18, %17 : vector<30x128xf32>
    %20 = math.tanh %19 : vector<30x128xf32>
    %cst_14 = arith.constant 5.000000e-01 : f32
    %21 = vector.broadcast %cst_14 : f32 to vector<30x128xf32>
    %22 = arith.mulf %21, %20 : vector<30x128xf32>
    %cst_15 = arith.constant 5.000000e-01 : f32
    %23 = vector.broadcast %cst_15 : f32 to vector<30x128xf32>
    %24 = arith.addf %22, %23 : vector<30x128xf32>
    %c0_16 = arith.constant 0 : index
    %c0_17 = arith.constant 0 : index
    %25 = vector.load %arg6[%c0_16, %c0_17] : memref<1x30xf32, #tpu.memory_space<vmem>>, vector<1x30xf32>
    %cst_18 = arith.constant dense<0.000000e+00> : vector<1x128xf32>
    %26 = tpu.matmul %25, %24, %cst_18 {dimension_numbers = #tpu.dot_dimension_numbers<[1], [0], [0], [1], [0, 0, 1, 1], [], []>} : vector<1x30xf32>, vector<30x128xf32>, vector<1x128xf32> -> vector<1x128xf32>
    %c0_19 = arith.constant 0 : index
    %c0_20 = arith.constant 0 : index
    %27 = vector.load %arg7[%c0_19, %c0_20] : memref<1x1xf32, #tpu.memory_space<vmem>>, vector<1x1xf32>
    %28 = vector.broadcast %27 : vector<1x1xf32> to vector<1x128xf32>
    %29 = arith.addf %26, %28 : vector<1x128xf32>
    %cst_21 = arith.constant 5.000000e-01 : f32
    %30 = vector.broadcast %cst_21 : f32 to vector<1x128xf32>
    %31 = arith.mulf %30, %29 : vector<1x128xf32>
    %32 = math.tanh %31 : vector<1x128xf32>
    %cst_22 = arith.constant 5.000000e-01 : f32
    %33 = vector.broadcast %cst_22 : f32 to vector<1x128xf32>
    %34 = arith.mulf %33, %32 : vector<1x128xf32>
    %cst_23 = arith.constant 5.000000e-01 : f32
    %35 = vector.broadcast %cst_23 : f32 to vector<1x128xf32>
    %36 = arith.addf %34, %35 : vector<1x128xf32>
    %c0_24 = arith.constant 0 : index
    %c0_25 = arith.constant 0 : index
    %37 = vector.load %arg8[%c0_24, %c0_25] : memref<1x128xf32, #tpu.memory_space<vmem>>, vector<1x128xf32>
    tpu.vector_store %arg8[%c0_24, %c0_25], %36 {strides = array<i32>} : memref<1x128xf32, #tpu.memory_space<vmem>>, vector<1x128xf32>,
    return
  }
  func.func @transform_0(%arg0: i32) -> (i32, i32) {
    %c0_i32 = arith.constant 0 : i32
    %c0_i32_0 = arith.constant 0 : i32
    return %c0_i32, %arg0 : i32, i32
  }
  func.func @transform_1(%arg0: i32) -> (i32, i32) {
    %c0_i32 = arith.constant 0 : i32
    %c0_i32_0 = arith.constant 0 : i32
    %c0_i32_1 = arith.constant 0 : i32
    return %c0_i32, %c0_i32_0 : i32, i32
  }
  func.func @transform_2(%arg0: i32) -> (i32, i32) {
    %c0_i32 = arith.constant 0 : i32
    %c0_i32_0 = arith.constant 0 : i32
    %c0_i32_1 = arith.constant 0 : i32
    return %c0_i32, %c0_i32_0 : i32, i32
  }
  func.func @transform_3(%arg0: i32) -> (i32, i32) {
    %c0_i32 = arith.constant 0 : i32
    %c0_i32_0 = arith.constant 0 : i32
    %c0_i32_1 = arith.constant 0 : i32
    return %c0_i32, %c0_i32_0 : i32, i32
  }
  func.func @transform_4(%arg0: i32) -> (i32, i32) {
    %c0_i32 = arith.constant 0 : i32
    %c0_i32_0 = arith.constant 0 : i32
    %c0_i32_1 = arith.constant 0 : i32
    return %c0_i32, %c0_i32_0 : i32, i32
  }
  func.func @transform_5(%arg0: i32) -> (i32, i32) {
    %c0_i32 = arith.constant 0 : i32
    %c0_i32_0 = arith.constant 0 : i32
    %c0_i32_1 = arith.constant 0 : i32
    return %c0_i32, %c0_i32_0 : i32, i32
  }
  func.func @transform_6(%arg0: i32) -> (i32, i32) {
    %c0_i32 = arith.constant 0 : i32
    %c0_i32_0 = arith.constant 0 : i32
    %c0_i32_1 = arith.constant 0 : i32
    return %c0_i32, %c0_i32_0 : i32, i32
  }
  func.func @transform_7(%arg0: i32) -> (i32, i32) {
    %c0_i32 = arith.constant 0 : i32
    %c0_i32_0 = arith.constant 0 : i32
    return %c0_i32, %arg0 : i32, i32
  }
}

</mosaic_0001>

<bundles_post_ra>
// kernel: tpu_custom_call.1
= control target key start
LH: loop header
LB: loop body
LE: loop exit
PB: predicated region body
PF: predicated region fallthrough
CT: control target
= control target key end

     0   :  { %s707_s0 = inlined_call_operand.vmem [shape: f32[10,128], index: 0, kind: input, shape index: {}]   ;;  %s708_s1 = inlined_call_operand.vmem [shape: f32[30,10], index: 1, kind: input, shape index: {}]   ;;  %s709_s2 = inlined_call_operand.vmem [shape: f32[30,1], index: 2, kind: input, shape index: {}]   ;;  %s710_s3 = inlined_call_operand.vmem [shape: f32[30,30], index: 3, kind: input, shape index: {}]   ;;  %s711_s4 = inlined_call_operand.vmem [shape: f32[30,1], index: 4, kind: input, shape index: {}]   ;;  %s712_s5 = inlined_call_operand.vmem [shape: f32[1,30], index: 5, kind: input, shape index: {}]   ;;  %s713_s6 = inlined_call_operand.<no memory space> [shape: f32[1,1], index: 6, kind: input, shape index: {}]   ;;  %s714_s7 = inlined_call_operand.hbm [shape: f32[1,128], index: 7, kind: output, shape index: {}]  }
   0x1   :  { %v12_v0 = vstv %s713_s6 }
   0x2   :  { %13 = vst [vmem:[#allocation2] sm:$0x1] %v12_v0 }
   0x3   :  { %v29_v1 = vld [vmem:[%s707_s0] sm:$0xff]  ;;  %v30_v2 = vld [vmem:[%s707_s0 + $0x8] sm:$0x3]  ;;  %vm72_vm0 = vcmask 1041408   ;;  %vm568_vm1 = vmmov 1   ;;  %vm59_vm3 = vcmask 80896  }
   0x4   :  { %v495_v3 = vpack.c.bf16 %v30_v2, %v29_v1  ;;  %vm496_vm2 = vmpackc.low %vm72_vm0, %vm568_vm1  ;;  %v31_v4 = vld [vmem:[%s708_s1] sm:$0xff]  ;;  %v569_v5 = vmov 0   ;;  %v37_v7 = vld [vmem:[%s709_s2 + $0x10] sm:$0xff] }
   0x5   :  { %464 = vmatprep.mubr.msk.f32.mxu0 %vm59_vm3, %v31_v4  ;;  %524 = vset.pattern.permute.xlu0 %v569_v5  ;;  %v35_v6 = vld [vmem:[%s709_s2] sm:$0xff]  ;;  %v32_v8 = vld [vmem:[%s708_s1 + $0x8] sm:$0xff]  ;;  %v33_v9 = vld [vmem:[%s708_s1 + $0x10] sm:$0xff] }
   0x6   :  { %497 = vmatprep.subr.msk.bf16.mxu0 %vm496_vm2, %v495_v3  ;;  %525 = vset.pattern.permute.xlu1 %v569_v5  ;;  %v36_v10 = vld [vmem:[%s709_s2 + $0x8] sm:$0xff]  ;;  %v38_v11 = vld [vmem:[%s709_s2 + $0x18] sm:$0x3f] }
   0x7   :  { %500 = vmatpush3.bf16.msk.msra.mxu0 %vm496_vm2, %v495_v3  ;;  %41 = vperm.xlu0 %524, %v35_v6  }
   0x8   :  { %51 = vperm.xlu1 %525, %v37_v7  }
   0x9   :  { %14 = vsyncpa [#allocation4], 0  ;;  %v34_v12 = vld [vmem:[%s708_s1 + $0x18] sm:$0x3f]  ;;  %v181_v13 = vld [vmem:[%s711_s4] sm:$0xff]  ;;  %vm205_vm4 = vcmask 244736  }
   0xa   :  { %465 = vmatmul.mubr.msk.f32.vlgmr.msra.gmra.mrb[0].mxu0 %vm59_vm3, %v32_v8  ;;  %v182_v14 = vld [vmem:[%s711_s4 + $0x8] sm:$0xff]  ;;  %v183_v15 = vld [vmem:[%s711_s4 + $0x10] sm:$0xff]  ;;  %v184_v16 = vld [vmem:[%s711_s4 + $0x18] sm:$0x3f]  ;;  %vm218_vm5 = vcmask 1045504   ;;  %v570_v53 = vmov 0.0|0.0  }
   0xb   :  { %467 = vmatprep.mubr.msk.f32.mxu0 %vm59_vm3, %v33_v9  ;;  %46 = vperm.xlu0 %524, %v36_v10   ;;  %v324_v17 = vld [vmem:[#allocation2] sm:$0x1]  ;;  %vm669_vm6 = vmpackc.low %vm218_vm5, %vm568_vm1  ;;  %v178_v50 = vld [vmem:[%s710_s3 + $0x8] sm:$0xff]  ;;  %vm571_vm7 = vmmov 0   ;;  %v572_v54 = vmov 0.0   ;;  %s573_s10 = smov [#allocation3]  }
   0xc   :  { %56 = vperm.xlu1 %525, %v38_v11   ;;  %v177_v18 = vld [vmem:[%s710_s3] sm:$0xff]  ;;  %v179_v51 = vld [vmem:[%s710_s3 + $0x10] sm:$0xff]  ;;  %v180_v52 = vld [vmem:[%s710_s3 + $0x18] sm:$0x3f]  ;;  %511 = vmatprep.subr.bf16.mxu0 %v570_v53  ;;  %s421_s11 = sshll.u32 %s573_s10, 4  ;;  %s422_s11 = int_to_ptr.vmem [resolvable:$true] %s421_s11 }
   0xd   :  { %478 = vmatprep.mubr.msk.f32.mxu1 %vm205_vm4, %v177_v18  ;;  %s548_s12 = scalar_lea.vmem %s422_s11, 32  ;;  %p549_p1 = scmp.lt.s32.totalorder %s422_s11, %s422_s11 }
   0xe   :  { %468 = vmatmul.mubr.msk.f32.gmra.mrb[2].mxu0 %vm59_vm3, %v34_v12 }
   0xf   :  { %187 = vperm.xlu0 %524, %v181_v13   ;;  %492 = vmatprep.mubr.msk.f32.mxu0 %vm571_vm7, %v572_v54 }
  0x10   :  { %192 = vperm.xlu1 %525, %v182_v14  }
  0x13   :  { %197 = vperm.xlu0 %524, %v183_v15  }
  0x14   :  { %202 = vperm.xlu1 %525, %v184_v16  }
  0x17   :  { %327 = vperm.xlu0 %524, %v324_v17  }
  0x86   :  { %v42_v19 = vpop.permute.xlu0 %41 }
  0x87   :  { %v52_v20 = vpop.permute.xlu1 %51 }
  0x8a   :  { %v47_v21 = vpop.permute.xlu0 %46 }
  0x8b   :  { %v57_v27 = vpop.permute.xlu1 %56 }
  0x8e   :  { %v188_v56 = vpop.permute.xlu0 %187 }
  0x8f   :  { %v193_v55 = vpop.permute.xlu1 %192 }
  0x92   :  { %v198_v1 = vpop.permute.xlu0 %197 }
  0x93   :  { %v203_v62 = vpop.permute.xlu1 %202 }
  0xdd   :  { %v466_v22 = vpop.f32.mrb[0].mxu0 }
  0xde   :  { %v148_v23 = vadd.f32 %v466_v22, %v47_v21  ;;  %v142_v24 = vpop.f32.mrb[1].mxu0  ;;  %v323_v21 = vld [vmem:[%s712_s5] sm:$0x1]  ;;  %v330_v22 = vlaneseq  ;;  %s544_s5 = scalar_lea.vmem %s422_s11, 16 }
  0xdf   :  { %v143_v25 = vadd.f32 %v142_v24, %v42_v19  ;;  %p545_p0 = scmp.ne.s32.totalorder %s422_s11, %s544_s5  ;;  %p550_p2 = scmp.lt.s32.totalorder %s548_s12, %s544_s5 }
  0xe0   :  { %v162_v26 = vmul.f32 0.5, %v148_v23  ;;  %v331_v23 = vshrl.u32 %v330_v22, 7 }
  0xe1   :  { %v161_v28 = vmul.f32 0.5, %v143_v25  ;;  %v469_v29 = vpop.f32.mrb[2].mxu0  ;;  %v328_v25 = vpop.permute.xlu0 %327  ;;  %p551_p3 = por %p550_p2, %p549_p1 }
  0xe2   :  { %526 = vtanh.f32 %v162_v26  ;;  %v158_v30 = vadd.f32 %v469_v29, %v57_v27  ;;  %v152_v31 = vpop.f32.mrb[3].mxu0  ;;  %v332_v24 = vsub.s32 0, %v331_v23 }
  0xe3   :  { %528 = vtanh.f32 %v161_v28  ;;  %v153_v32 = vadd.f32 %v152_v31, %v52_v20  ;;  %p552_p4 = pnand %p551_p3, %p545_p0 }
  0xe4   :  { %v164_v33 = vmul.f32 0.5, %v158_v30  ;;  %v333_v26 = vrot.slane %v328_v25, %v332_v24 }
  0xe5   :  { %v163_v34 = vmul.f32 0.5, %v153_v32 }
  0xe6   :  { %530 = vtanh.f32 %v164_v33 }
  0xe7   :  { %532 = vtanh.f32 %v163_v34 }
  0xec   :  { %v527_v35 = vpop.eup %526 }
  0xed   :  { %v529_v36 = vpop.eup %528  ;;  %v170_v37 = vmul.f32 0.5, %v527_v35 }
  0xee   :  { %v169_v38 = vmul.f32 0.5, %v529_v36 }
  0xef   :  { %v174_v39 = vadd.f32 0.5, %v170_v37 }
  0xf0   :  { %v531_v40 = vpop.eup %530  ;;  %v173_v41 = vadd.f32 0.5, %v169_v38 }
  0xf1   :  { %v533_v42 = vpop.eup %532  ;;  %v172_v43 = vmul.f32 0.5, %v531_v40 }
  0xf2   :  { %v171_v44 = vmul.f32 0.5, %v533_v42  ;;  %v501_v45 = vpack.c.bf16 %v174_v39, %v173_v41 }
  0xf3   :  { %v176_v46 = vadd.f32 0.5, %v172_v43 }
  0xf4   :  { %v175_v47 = vadd.f32 0.5, %v171_v44  ;;  %502 = vmatprep.subr.bf16.mxu1 %v501_v45 }
  0xf5   :  { %504 = vmatpush3.bf16.msra.mxu1 %v501_v45 }
  0xf6   :  { %v505_v49 = vpack.c.bf16 %v176_v46, %v175_v47 }
  0xf8   :  { %507 = vmatprep.subr.msk.bf16.mxu1 %vm669_vm6, %v505_v49 }
  0xf9   :  { %510 = vmatpush3.bf16.msk.msra.mxu1 %vm669_vm6, %v505_v49 }
  0xfc   :  { %479 = vmatmul.mubr.msk.f32.vlgmr.msra.gmra.mrb[0].mxu1 %vm205_vm4, %v178_v50 }
  0xfd   :  { %481 = vmatprep.mubr.msk.f32.mxu1 %vm205_vm4, %v179_v51 }
 0x100   :  { %482 = vmatmul.mubr.msk.f32.gmra.mrb[2].mxu1 %vm205_vm4, %v180_v52 }
 0x1cf   :  { %v480_v57 = vpop.f32.mrb[0].mxu1 }
 0x1d0   :  { %v294_v58 = vadd.f32 %v480_v57, %v193_v55  ;;  %v288_v59 = vpop.f32.mrb[1].mxu1 }
 0x1d1   :  { %v289_v60 = vadd.f32 %v288_v59, %v188_v56 }
 0x1d2   :  { %v308_v61 = vmul.f32 0.5, %v294_v58 }
 0x1d3   :  { %v307_v63 = vmul.f32 0.5, %v289_v60  ;;  %v483_v0 = vpop.f32.mrb[2].mxu1 }
 0x1d4   :  { %534 = vtanh.f32 %v308_v61  ;;  %v304_v2 = vadd.f32 %v483_v0, %v203_v62  ;;  %v298_v3 = vpop.f32.mrb[3].mxu1 }
 0x1d5   :  { %536 = vtanh.f32 %v307_v63  ;;  %v299_v4 = vadd.f32 %v298_v3, %v198_v1 }
 0x1d6   :  { %v310_v5 = vmul.f32 0.5, %v304_v2 }
 0x1d7   :  { %v309_v6 = vmul.f32 0.5, %v299_v4 }
 0x1d8   :  { %538 = vtanh.f32 %v310_v5 }
 0x1d9   :  { %540 = vtanh.f32 %v309_v6 }
 0x1de   :  { %v535_v7 = vpop.eup %534 }
 0x1df   :  { %v537_v8 = vpop.eup %536  ;;  %v316_v9 = vmul.f32 0.5, %v535_v7 }
 0x1e0   :  { %v315_v10 = vmul.f32 0.5, %v537_v8 }
 0x1e1   :  { %v320_v11 = vadd.f32 0.5, %v316_v9 }
 0x1e2   :  { %v539_v12 = vpop.eup %538  ;;  %v319_v13 = vadd.f32 0.5, %v315_v10 }
 0x1e3   :  { %v541_v14 = vpop.eup %540  ;;  %v318_v15 = vmul.f32 0.5, %v539_v12 }
 0x1e4   :  { %v512_v16 = vpack.c.bf16 %v320_v11, %v319_v13  ;;  %v317_v17 = vmul.f32 0.5, %v541_v14 }
 0x1e5   :  { %v322_v18 = vadd.f32 0.5, %v318_v15 }
 0x1e6   :  { %v321_v19 = vadd.f32 0.5, %v317_v17  ;;  %513 = vmatpush3.bf16.msra.mxu0 %v512_v16 }
 0x1e7   :  { %514 = vmatprep.subr.bf16.mxu0 %v570_v53 }
 0x1e8   :  { %v515_v20 = vpack.c.bf16 %v322_v18, %v321_v19 }
 0x1ea   :  { %517 = vmatpush3.bf16.msk.msra.mxu0 %vm669_vm6, %v515_v20 }
 0x1ed   :  { %493 = vmatmul.mubr.msk.f32.vlgmr.msra.gmra.mrb[4].mxu0 %vm205_vm4, %v323_v21 }
 0x2c0   :  { %v406_v27 = vpop.f32.mrb[4].mxu0 }
 0x2c1   :  { %v407_v28 = vadd.f32 %v406_v27, %v333_v26  ;;  %v494_v29 = vpop.f32.mrb[5].mxu0 }
 0x2c3   :  { %v410_v30 = vmul.f32 0.5, %v407_v28 }
 0x2c5   :  { %542 = vtanh.f32 %v410_v30 }
 0x2cf   :  { %v543_v31 = vpop.eup %542 }
 0x2d0   :  { %v412_v32 = vmul.f32 0.5, %v543_v31 }
 0x2d2   :  { %v413_v33 = vadd.f32 0.5, %v412_v32 }
 0x2d4   :  { %414 = vst [vmem:[#allocation3] sm:$0x1] %v413_v33 }
 0x2d5   :  { %555 = shalt.err (!%p552_p4)
}
 0x2d6   :  { %s556_s15 = scalar_lea.hbm %s714_s7, 16 }
 0x2d7   :  { %p557_p5 = scmp.ne.s32.totalorder %s714_s7, %s556_s15  ;;  %p560_p6 = scmp.lt.u32.totalorder %s556_s15, %s714_s7 }
 0x2d9   :  { %p562_p7 = pnand %p560_p6, %p557_p5 }
 0x2db   :  { %565 = shalt.err (!%p562_p7)
}
 0x2dc   :  { %424 = dma.vmem_to_hbm [thread:$0]  %s422_s11, 16, %s714_s7, [#allocation4]  }
 0x2dd   :  { %566 = dma.done.wait [#allocation4], 16  }
 0x2de   :  { %567 = vsyncadd [#allocation4], 4294967280 }
 0x2df   :  { %428 = vsyncpa [#allocation4], 1 }

</bundles_post_ra>
